<compile_context>
chip_gen: v7x
topology: tpu7x:2x2x1
jax: 0.10.0
libtpu: 0.0.40
codegen_flags: <defaults>
</compile_context>

<pallas_src>
import jax
import jax.numpy as jnp
from jax.experimental import pallas as pl
from jax.experimental.pallas import tpu as pltpu

FEATS = 16            # in/out features of every Linear layer in FlatMLPNet
PACK = 8              # rows packed into one lane-dense row
LANES = PACK * FEATS  # 128 = full vreg lane width


def _round_up(n: int, m: int) -> int:
    return ((n + m - 1) // m) * m


def _flat_mlp_kernel(x_ref, w1_ref, b1_ref, w2_ref, b2_ref, w3_ref, b3_ref, o_ref):
    # I/O may be bf16; compute in f32 (safe on v5e, accurate everywhere).
    x = x_ref[...].astype(jnp.float32)

    # fc1 + ReLU  (block-diagonal 128x128 weight == 8 independent 16x16 GEMMs)
    h = jnp.dot(x, w1_ref[...], preferred_element_type=jnp.float32) + b1_ref[...]
    h = jnp.maximum(h, 0.0)

    # fc2 + ReLU
    h = jnp.dot(h, w2_ref[...], preferred_element_type=jnp.float32) + b2_ref[...]
    h = jnp.maximum(h, 0.0)

    # fc3 + Sigmoid
    h = jnp.dot(h, w3_ref[...], preferred_element_type=jnp.float32) + b3_ref[...]
    o_ref[...] = jax.nn.sigmoid(h).astype(o_ref.dtype)


def flat_mlp_forward(x, params, *, tile_rows=512, io_dtype=None):
    """Forward pass of FlatMLPNet.

    x: (B, 16) array.  params: dict w1,b1,w2,b2,w3,b3 with w stored (in, out).
    tile_rows: packed-row tile size (multiple of 16).  io_dtype: dtype used for
    the x/out HBM stream (e.g. jnp.bfloat16 to halve bandwidth); compute is f32.
    """
    B, F = x.shape
    assert F == FEATS
    assert tile_rows % 16 == 0
    io_dtype = jnp.dtype(io_dtype) if io_dtype is not None else jnp.dtype(x.dtype)

    # ---- lane-dense repack of parameters (tiny, done once per call in XLA) ----
    eye = jnp.eye(PACK, dtype=jnp.float32)
    w_pk = [jnp.kron(eye, params[f"w{i}"].astype(jnp.float32)) for i in (1, 2, 3)]
    b_pk = [jnp.tile(params[f"b{i}"].astype(jnp.float32), (1, PACK)) for i in (1, 2, 3)]

    # ---- pack x: (B,16) -> (rows_p, 128), padded so the grid tiles evenly ----
    rows = pl.cdiv(B, PACK)                   # packed rows needed
    rows16 = _round_up(rows, 16)              # sublane-safe also for bf16
    TB = min(tile_rows, rows16)               # packed-row tile
    rows_p = _round_up(rows16, TB)            # padded packed rows (TB | rows_p)
    B_pad = rows_p * PACK
    x_p = jnp.pad(x, ((0, B_pad - B), (0, 0))).reshape(rows_p, LANES).astype(io_dtype)

    grid = (rows_p // TB,)
    io_bytes = io_dtype.itemsize
    cost = pl.CostEstimate(
        flops=3 * 2 * B_pad * FEATS * FEATS,
        transcendentals=B_pad * FEATS,  # sigmoid exp
        bytes_accessed=2 * rows_p * LANES * io_bytes
        + sum(int(w.size) * 4 for w in w_pk)
        + sum(int(b.size) * 4 for b in b_pk),
    )

    x_spec = pl.BlockSpec((TB, LANES), lambda i: (i, 0))
    o_spec = pl.BlockSpec((TB, LANES), lambda i: (i, 0))
    w_spec = pl.BlockSpec((LANES, LANES), lambda i: (0, 0))   # VMEM-resident
    b_spec = pl.BlockSpec((1, LANES), lambda i: (0, 0))       # VMEM-resident

    out_p = pl.pallas_call(
        _flat_mlp_kernel,
        out_shape=jax.ShapeDtypeStruct((rows_p, LANES), io_dtype),
        grid=grid,
        in_specs=[x_spec, w_spec, b_spec, w_spec, b_spec, w_spec, b_spec],
        out_specs=o_spec,
        compiler_params=pltpu.CompilerParams(
            dimension_semantics=("parallel",),        # v7x megacore sharding
            vmem_limit_bytes=32 * 1024 * 1024,        # headroom, safe on v5e..v7x
        ),
        cost_estimate=cost,
    )(x_p, w_pk[0], b_pk[0], w_pk[1], b_pk[1], w_pk[2], b_pk[2])

    # Unpack back to (B, 16) and drop padding rows.
    return out_p.reshape(B_pad, FEATS)[:B]


def init_params(key):
    """Deterministic init mimicking nn.Linear default uniform(-1/sqrt(in), 1/sqrt(in))."""
    bound = 1.0 / jnp.sqrt(jnp.float32(FEATS))
    keys = jax.random.split(key, 6)
    params = {}
    for i, name in enumerate(["1", "2", "3"]):
        wk, bk = keys[2 * i], keys[2 * i + 1]
        # stored as (in, out) so the kernel does x @ W  (== x @ W_pt.T + b)
        params[f"w{name}"] = jax.random.uniform(wk, (FEATS, FEATS), jnp.float32, -bound, bound)
        params[f"b{name}"] = jax.random.uniform(bk, (1, FEATS), jnp.float32, -bound, bound)
    return params


def reference_forward(x, params):
    """Pure-JAX reference for correctness check."""
    h = jnp.maximum(x @ params["w1"] + params["b1"], 0.0)
    h = jnp.maximum(h @ params["w2"] + params["b2"], 0.0)
    return jax.nn.sigmoid(h @ params["w3"] + params["b3"])


if __name__ == "__main__":
    key = jax.random.PRNGKey(0)
    pkey, xkey, xkey2 = jax.random.split(key, 3)
    params = init_params(pkey)

    # Case 1 (small): batch not a multiple of PACK -> exercises pad + unpack,
    # single grid step.
    x = jax.random.normal(xkey, (32, FEATS), jnp.float32)
    out = jax.block_until_ready(flat_mlp_forward(x, params, tile_rows=16))
    ref = reference_forward(x, params)
    assert out.shape == x.shape
    assert jnp.allclose(out, ref, atol=2e-5, rtol=1e-5)

    # Case 2: multiple grid steps -> double-buffered x/out DMA over the batch
    # axis, weights stay resident.
    x2 = jax.random.normal(xkey2, (1024, FEATS), jnp.float32)
    out2 = jax.block_until_ready(flat_mlp_forward(x2, params, tile_rows=64))
    ref2 = reference_forward(x2, params)
    assert jnp.allclose(out2, ref2, atol=2e-5, rtol=1e-5)

    # Case 3: bf16 activation stream (half the HBM traffic), f32 compute inside.
    out3 = jax.block_until_ready(
        flat_mlp_forward(x2, params, tile_rows=64, io_dtype=jnp.bfloat16)
    )
    assert jnp.allclose(out3.astype(jnp.float32), ref2, atol=5e-2, rtol=0.0)

    print("KERNEL_OK")
</pallas_src>

<mosaic_0001>
module attributes {stable_mosaic.version = 11 : i64} {
  func.func @_flat_mlp_kernel(%arg0: i32, %arg1: memref<16x128xf32, #tpu.memory_space<vmem>>, %arg2: memref<128x128xf32, #tpu.memory_space<vmem>>, %arg3: memref<1x128xf32, #tpu.memory_space<vmem>>, %arg4: memref<128x128xf32, #tpu.memory_space<vmem>>, %arg5: memref<1x128xf32, #tpu.memory_space<vmem>>, %arg6: memref<128x128xf32, #tpu.memory_space<vmem>>, %arg7: memref<1x128xf32, #tpu.memory_space<vmem>>, %arg8: memref<16x128xf32, #tpu.memory_space<vmem>>) attributes {dimension_semantics = [#tpu.dimension_semantics<parallel>], iteration_bounds = array<i64: 1>, scalar_prefetch = 0 : i64, scratch_operands = 0 : i64, tpu.core_type = #tpu.core_type<tc>, window_params = [{transform_indices = @transform_0, window_bounds = array<i64: 16, 128>}, {pipeline_mode = #tpu.pipeline_mode<synchronous>, transform_indices = @transform_1, window_bounds = array<i64: 128, 128>}, {pipeline_mode = #tpu.pipeline_mode<synchronous>, transform_indices = @transform_2, window_bounds = array<i64: 1, 128>}, {pipeline_mode = #tpu.pipeline_mode<synchronous>, transform_indices = @transform_3, window_bounds = array<i64: 128, 128>}, {pipeline_mode = #tpu.pipeline_mode<synchronous>, transform_indices = @transform_4, window_bounds = array<i64: 1, 128>}, {pipeline_mode = #tpu.pipeline_mode<synchronous>, transform_indices = @transform_5, window_bounds = array<i64: 128, 128>}, {pipeline_mode = #tpu.pipeline_mode<synchronous>, transform_indices = @transform_6, window_bounds = array<i64: 1, 128>}, {transform_indices = @transform_7, window_bounds = array<i64: 16, 128>}]} {
    %c0 = arith.constant 0 : index
    %c0_0 = arith.constant 0 : index
    %0 = vector.load %arg1[%c0, %c0_0] : memref<16x128xf32, #tpu.memory_space<vmem>>, vector<16x128xf32>
    %c0_1 = arith.constant 0 : index
    %c0_2 = arith.constant 0 : index
    %1 = vector.load %arg2[%c0_1, %c0_2] : memref<128x128xf32, #tpu.memory_space<vmem>>, vector<128x128xf32>
    %cst = arith.constant dense<0.000000e+00> : vector<16x128xf32>
    %2 = tpu.matmul %0, %1, %cst {dimension_numbers = #tpu.dot_dimension_numbers<[1], [0], [0], [1], [0, 0, 1, 1], [], []>} : vector<16x128xf32>, vector<128x128xf32>, vector<16x128xf32> -> vector<16x128xf32>
    %c0_3 = arith.constant 0 : index
    %c0_4 = arith.constant 0 : index
    %3 = vector.load %arg3[%c0_3, %c0_4] : memref<1x128xf32, #tpu.memory_space<vmem>>, vector<1x128xf32>
    %4 = vector.broadcast %3 : vector<1x128xf32> to vector<16x128xf32>
    %5 = arith.addf %2, %4 : vector<16x128xf32>
    %cst_5 = arith.constant 0.000000e+00 : f32
    %6 = vector.broadcast %cst_5 : f32 to vector<16x128xf32>
    %7 = arith.maximumf %5, %6 : vector<16x128xf32>
    %c0_6 = arith.constant 0 : index
    %c0_7 = arith.constant 0 : index
    %8 = vector.load %arg4[%c0_6, %c0_7] : memref<128x128xf32, #tpu.memory_space<vmem>>, vector<128x128xf32>
    %cst_8 = arith.constant dense<0.000000e+00> : vector<16x128xf32>
    %9 = tpu.matmul %7, %8, %cst_8 {dimension_numbers = #tpu.dot_dimension_numbers<[1], [0], [0], [1], [0, 0, 1, 1], [], []>} : vector<16x128xf32>, vector<128x128xf32>, vector<16x128xf32> -> vector<16x128xf32>
    %c0_9 = arith.constant 0 : index
    %c0_10 = arith.constant 0 : index
    %10 = vector.load %arg5[%c0_9, %c0_10] : memref<1x128xf32, #tpu.memory_space<vmem>>, vector<1x128xf32>
    %11 = vector.broadcast %10 : vector<1x128xf32> to vector<16x128xf32>
    %12 = arith.addf %9, %11 : vector<16x128xf32>
    %cst_11 = arith.constant 0.000000e+00 : f32
    %13 = vector.broadcast %cst_11 : f32 to vector<16x128xf32>
    %14 = arith.maximumf %12, %13 : vector<16x128xf32>
    %c0_12 = arith.constant 0 : index
    %c0_13 = arith.constant 0 : index
    %15 = vector.load %arg6[%c0_12, %c0_13] : memref<128x128xf32, #tpu.memory_space<vmem>>, vector<128x128xf32>
    %cst_14 = arith.constant dense<0.000000e+00> : vector<16x128xf32>
    %16 = tpu.matmul %14, %15, %cst_14 {dimension_numbers = #tpu.dot_dimension_numbers<[1], [0], [0], [1], [0, 0, 1, 1], [], []>} : vector<16x128xf32>, vector<128x128xf32>, vector<16x128xf32> -> vector<16x128xf32>
    %c0_15 = arith.constant 0 : index
    %c0_16 = arith.constant 0 : index
    %17 = vector.load %arg7[%c0_15, %c0_16] : memref<1x128xf32, #tpu.memory_space<vmem>>, vector<1x128xf32>
    %18 = vector.broadcast %17 : vector<1x128xf32> to vector<16x128xf32>
    %19 = arith.addf %16, %18 : vector<16x128xf32>
    %20 = arith.negf %19 : vector<16x128xf32>
    %21 = math.exp %20 : vector<16x128xf32>
    %cst_17 = arith.constant 1.000000e+00 : f32
    %22 = vector.broadcast %cst_17 : f32 to vector<16x128xf32>
    %23 = arith.addf %22, %21 : vector<16x128xf32>
    %24 = arith.divf %22, %23 : vector<16x128xf32>
    %c0_18 = arith.constant 0 : index
    %c0_19 = arith.constant 0 : index
    %25 = vector.load %arg8[%c0_18, %c0_19] : memref<16x128xf32, #tpu.memory_space<vmem>>, vector<16x128xf32>
    tpu.vector_store %arg8[%c0_18, %c0_19], %24 {strides = array<i32>} : memref<16x128xf32, #tpu.memory_space<vmem>>, vector<16x128xf32>,
    return
  }
  func.func @transform_0(%arg0: i32) -> (i32, i32) {
    %c0_i32 = arith.constant 0 : i32
    %c0_i32_0 = arith.constant 0 : i32
    return %arg0, %c0_i32 : i32, i32
  }
  func.func @transform_1(%arg0: i32) -> (i32, i32) {
    %c0_i32 = arith.constant 0 : i32
    %c0_i32_0 = arith.constant 0 : i32
    %c0_i32_1 = arith.constant 0 : i32
    return %c0_i32, %c0_i32_0 : i32, i32
  }
  func.func @transform_2(%arg0: i32) -> (i32, i32) {
    %c0_i32 = arith.constant 0 : i32
    %c0_i32_0 = arith.constant 0 : i32
    %c0_i32_1 = arith.constant 0 : i32
    return %c0_i32, %c0_i32_0 : i32, i32
  }
  func.func @transform_3(%arg0: i32) -> (i32, i32) {
    %c0_i32 = arith.constant 0 : i32
    %c0_i32_0 = arith.constant 0 : i32
    %c0_i32_1 = arith.constant 0 : i32
    return %c0_i32, %c0_i32_0 : i32, i32
  }
  func.func @transform_4(%arg0: i32) -> (i32, i32) {
    %c0_i32 = arith.constant 0 : i32
    %c0_i32_0 = arith.constant 0 : i32
    %c0_i32_1 = arith.constant 0 : i32
    return %c0_i32, %c0_i32_0 : i32, i32
  }
  func.func @transform_5(%arg0: i32) -> (i32, i32) {
    %c0_i32 = arith.constant 0 : i32
    %c0_i32_0 = arith.constant 0 : i32
    %c0_i32_1 = arith.constant 0 : i32
    return %c0_i32, %c0_i32_0 : i32, i32
  }
  func.func @transform_6(%arg0: i32) -> (i32, i32) {
    %c0_i32 = arith.constant 0 : i32
    %c0_i32_0 = arith.constant 0 : i32
    %c0_i32_1 = arith.constant 0 : i32
    return %c0_i32, %c0_i32_0 : i32, i32
  }
  func.func @transform_7(%arg0: i32) -> (i32, i32) {
    %c0_i32 = arith.constant 0 : i32
    %c0_i32_0 = arith.constant 0 : i32
    return %arg0, %c0_i32 : i32, i32
  }
}

</mosaic_0001>

<bundles_post_ra>
// kernel: tpu_custom_call.1
= control target key start
LH: loop header
LB: loop body
LE: loop exit
PB: predicated region body
PF: predicated region fallthrough
CT: control target
= control target key end

     0   :  { %12 = vsyncpa [#allocation3], 0  ;;  %s953_s0 = inlined_call_operand.hbm [shape: f32[16,128], index: 0, kind: input, shape index: {}]   ;;  %s954_s1 = inlined_call_operand.hbm [shape: f32[128,128], index: 1, kind: input, shape index: {}]   ;;  %s955_s2 = inlined_call_operand.vmem [shape: f32[1,128], index: 2, kind: input, shape index: {}]   ;;  %s956_s3 = inlined_call_operand.hbm [shape: f32[128,128], index: 3, kind: input, shape index: {}]   ;;  %s957_s4 = inlined_call_operand.vmem [shape: f32[1,128], index: 4, kind: input, shape index: {}]   ;;  %s958_s5 = inlined_call_operand.hbm [shape: f32[128,128], index: 5, kind: input, shape index: {}]   ;;  %s959_s6 = inlined_call_operand.vmem [shape: f32[1,128], index: 6, kind: input, shape index: {}]   ;;  %s960_s7 = inlined_call_operand.hbm [shape: f32[16,128], index: 7, kind: output, shape index: {}]  }
   0x1   :  { %13 = vsyncpa [#allocation6], 0 }
   0x2   :  { %14 = vsyncpa [#allocation9], 0 }
   0x3   :  { %15 = vsyncpa [#allocation4], 0  ;;  %s808_s24 = smov [#allocation5]   ;;  %s809_s26 = smov [#allocation2]  }
   0x4   :  { %s33_s25 = sshll.u32 %s808_s24, 4  ;;  %s21_s27 = sshll.u32 %s809_s26, 4  ;;  %s34_s25 = int_to_ptr.vmem [resolvable:$true] %s33_s25  ;;  %s855_s27 = int_to_ptr.vmem [resolvable:$true] %s21_s27 }
   0x5   :  { %s690_s30 = scalar_lea.hbm %s954_s1, 2048 }
   0x6   :  { %p691_p0 = scmp.ne.s32.totalorder %s954_s1, %s690_s30  ;;  %p694_p1 = scmp.lt.u32.totalorder %s690_s30, %s954_s1 }
   0x8   :  { %p696_p2 = pnand %p694_p1, %p691_p0 }
   0xa   :  { %699 = shalt.err (!%p696_p2)
}
   0xb   :  { %s700_s12 = scalar_lea.vmem %s34_s25, 2048  ;;  %p705_p4 = scmp.lt.s32.totalorder %s34_s25, %s34_s25 }
   0xc   :  { %p701_p3 = scmp.ne.s32.totalorder %s34_s25, %s700_s12  ;;  %p706_p5 = scmp.lt.s32.totalorder %s700_s12, %s700_s12 }
   0xe   :  { %p707_p6 = por %p706_p5, %p705_p4 }
  0x10   :  { %p708_p7 = pnand %p707_p6, %p701_p3 }
  0x12   :  { %711 = shalt.err (!%p708_p7)
}
  0x13   :  { %s810_s13 = smov 128   ;;  %s811_s14 = smov 8  }
  0x14   :  { %39 = dma.hbm_to_vmem [thread:$0]  %s954_s1, 2048, %s34_s25, [#allocation6], %s810_s13, %s810_s13, %s811_s14  }
  0x15   :  { %s712_s19 = scalar_lea.hbm %s953_s0, 256 }
  0x16   :  { %p713_p8 = scmp.ne.s32.totalorder %s953_s0, %s712_s19  ;;  %p716_p9 = scmp.lt.u32.totalorder %s712_s19, %s953_s0 }
  0x18   :  { %p718_p10 = pnand %p716_p9, %p713_p8 }
  0x1a   :  { %721 = shalt.err (!%p718_p10)
}
  0x1b   :  { %s722_s24 = scalar_lea.vmem %s855_s27, 256  ;;  %p727_p12 = scmp.lt.s32.totalorder %s855_s27, %s855_s27 }
  0x1c   :  { %p723_p11 = scmp.ne.s32.totalorder %s855_s27, %s722_s24  ;;  %p728_p13 = scmp.lt.s32.totalorder %s722_s24, %s722_s24 }
  0x1e   :  { %p729_p0 = por %p728_p13, %p727_p12 }
  0x20   :  { %p730_p1 = pnand %p729_p0, %p723_p11 }
  0x22   :  { %733 = shalt.err (!%p730_p1)
}
  0x23   :  { %27 = dma.hbm_to_vmem [thread:$0]  %s953_s0, 256, %s855_s27, [#allocation3], %s810_s13, %s810_s13, %s811_s14  }
  0x24   :  { %s812_s26 = smov [#allocation7]   ;;  %s813_s29 = smov [#allocation8]  }
  0x25   :  { %s47_s28 = sshll.u32 %s812_s26, 4  ;;  %s61_s30 = sshll.u32 %s813_s29, 4  ;;  %s48_s28 = int_to_ptr.vmem [resolvable:$true] %s47_s28  ;;  %s892_s30 = int_to_ptr.vmem [resolvable:$true] %s61_s30 }
  0x26   :  { %s734_s10 = scalar_lea.hbm %s956_s3, 2048 }
  0x27   :  { %p735_p2 = scmp.ne.s32.totalorder %s956_s3, %s734_s10  ;;  %p738_p3 = scmp.lt.u32.totalorder %s734_s10, %s956_s3 }
  0x29   :  { %p740_p4 = pnand %p738_p3, %p735_p2 }
  0x2b   :  { %743 = shalt.err (!%p740_p4)
}
  0x2c   :  { %s744_s0 = scalar_lea.vmem %s48_s28, 2048  ;;  %p749_p6 = scmp.lt.s32.totalorder %s48_s28, %s48_s28 }
  0x2d   :  { %p745_p5 = scmp.ne.s32.totalorder %s48_s28, %s744_s0  ;;  %p750_p7 = scmp.lt.s32.totalorder %s744_s0, %s744_s0 }
  0x2f   :  { %p751_p8 = por %p750_p7, %p749_p6 }
  0x31   :  { %p752_p9 = pnand %p751_p8, %p745_p5 }
  0x33   :  { %755 = shalt.err (!%p752_p9)
}
  0x34   :  { %53 = dma.hbm_to_vmem [thread:$0]  %s956_s3, 2048, %s48_s28, [#allocation6], %s810_s13, %s810_s13, %s811_s14  }
  0x35   :  { %s756_s20 = scalar_lea.hbm %s958_s5, 2048 }
  0x36   :  { %p757_p10 = scmp.ne.s32.totalorder %s958_s5, %s756_s20  ;;  %p760_p11 = scmp.lt.u32.totalorder %s756_s20, %s958_s5 }
  0x38   :  { %p762_p12 = pnand %p760_p11, %p757_p10 }
  0x3a   :  { %765 = shalt.err (!%p762_p12)
}
  0x3b   :  { %s766_s1 = scalar_lea.vmem %s892_s30, 2048  ;;  %p771_p0 = scmp.lt.s32.totalorder %s892_s30, %s892_s30 }
  0x3c   :  { %p767_p13 = scmp.ne.s32.totalorder %s892_s30, %s766_s1  ;;  %p772_p1 = scmp.lt.s32.totalorder %s766_s1, %s766_s1 }
  0x3e   :  { %p773_p2 = por %p772_p1, %p771_p0 }
  0x40   :  { %p774_p3 = pnand %p773_p2, %p767_p13 }
  0x42   :  { %777 = shalt.err (!%p774_p3)
}
  0x43   :  { %67 = dma.hbm_to_vmem [thread:$0]  %s958_s5, 2048, %s892_s30, [#allocation9], %s810_s13, %s810_s13, %s811_s14  }
  0x44   :  { %800 = dma.done.wait [#allocation3], 256  }
  0x45   :  { %801 = vsyncadd [#allocation3], 4294967040 }
  0x46   :  { %802 = dma.done.wait [#allocation6], 4096  }
  0x47   :  { %803 = vsyncadd [#allocation6], 4294963200 }
  0x48   :  { %804 = dma.done.wait [#allocation9], 2048  }
  0x49   :  { %805 = vsyncadd [#allocation9], 4294965248  ;;  %v84_v0 = vld [vmem:[#allocation5] sm:$0xff]  ;;  %v85_v1 = vld [vmem:[#allocation5 + $0x8] sm:$0xff] }
  0x4a   :  { %v86_v2 = vld [vmem:[#allocation5 + $0x10] sm:$0xff]  ;;  %v579_v3 = vpack.c.bf16 %v85_v1, %v84_v0  ;;  %v87_v4 = vld [vmem:[#allocation5 + $0x18] sm:$0xff]  ;;  %v88_v6 = vld [vmem:[#allocation5 + $0x20] sm:$0xff] }
  0x4b   :  { %v583_v5 = vpack.c.bf16 %v87_v4, %v86_v2  ;;  %v89_v7 = vld [vmem:[#allocation5 + $0x28] sm:$0xff]  ;;  %v90_v9 = vld [vmem:[#allocation5 + $0x30] sm:$0xff]  ;;  %v91_v10 = vld [vmem:[#allocation5 + $0x38] sm:$0xff] }
  0x4c   :  { %580 = vmatprep.subr.bf16.mxu0 %v579_v3  ;;  %v587_v8 = vpack.c.bf16 %v89_v7, %v88_v6  ;;  %v82_v11 = vld [vmem:[#allocation2] sm:$0xff]  ;;  %v184_v12 = vld [vmem:[#allocation7] sm:$0xff]  ;;  %v185_v13 = vld [vmem:[#allocation7 + $0x8] sm:$0xff]  ;;  %v591_v20 = vpack.c.bf16 %v91_v10, %v90_v9 }
  0x4d   :  { %582 = vmatpush3.bf16.msra.mxu0 %v579_v3  ;;  %506 = vmatprep.mubr.f32.mxu0 %v82_v11  ;;  %v186_v14 = vld [vmem:[#allocation7 + $0x10] sm:$0xff]  ;;  %v611_v15 = vpack.c.bf16 %v185_v13, %v184_v12  ;;  %v187_v16 = vld [vmem:[#allocation7 + $0x18] sm:$0xff]  ;;  %v188_v18 = vld [vmem:[#allocation7 + $0x20] sm:$0xff] }
  0x4e   :  { %584 = vmatprep.subr.bf16.mxu0 %v583_v5  ;;  %v615_v17 = vpack.c.bf16 %v187_v16, %v186_v14  ;;  %v189_v19 = vld [vmem:[#allocation7 + $0x28] sm:$0xff]  ;;  %v92_v21 = vld [vmem:[#allocation5 + $0x40] sm:$0xff]  ;;  %v190_v24 = vld [vmem:[#allocation7 + $0x30] sm:$0xff] }
  0x4f   :  { %612 = vmatprep.subr.bf16.mxu1 %v611_v15  ;;  %v93_v22 = vld [vmem:[#allocation5 + $0x48] sm:$0xff]  ;;  %v619_v23 = vpack.c.bf16 %v189_v19, %v188_v18  ;;  %v191_v25 = vld [vmem:[#allocation7 + $0x38] sm:$0xff]  ;;  %v94_v27 = vld [vmem:[#allocation5 + $0x50] sm:$0xff] }
  0x50   :  { %614 = vmatpush3.bf16.msra.mxu1 %v611_v15  ;;  %v595_v26 = vpack.c.bf16 %v93_v22, %v92_v21  ;;  %v95_v28 = vld [vmem:[#allocation5 + $0x58] sm:$0xff]  ;;  %v623_v29 = vpack.c.bf16 %v191_v25, %v190_v24  ;;  %v192_v30 = vld [vmem:[#allocation7 + $0x40] sm:$0xff]  ;;  %v193_v31 = vld [vmem:[#allocation7 + $0x48] sm:$0xff] }
  0x51   :  { %586 = vmatpush3.bf16.msra.mxu0 %v583_v5  ;;  %616 = vmatprep.subr.bf16.mxu1 %v615_v17  ;;  %v599_v32 = vpack.c.bf16 %v95_v28, %v94_v27  ;;  %v96_v33 = vld [vmem:[#allocation5 + $0x60] sm:$0xff]  ;;  %v97_v34 = vld [vmem:[#allocation5 + $0x68] sm:$0xff]  ;;  %v627_v35 = vpack.c.bf16 %v193_v31, %v192_v30  ;;  %v194_v36 = vld [vmem:[#allocation7 + $0x50] sm:$0xff] }
  0x52   :  { %588 = vmatprep.subr.bf16.mxu0 %v587_v8  ;;  %v195_v37 = vld [vmem:[#allocation7 + $0x58] sm:$0xff]  ;;  %v603_v38 = vpack.c.bf16 %v97_v34, %v96_v33  ;;  %v98_v39 = vld [vmem:[#allocation5 + $0x70] sm:$0xff]  ;;  %v196_v42 = vld [vmem:[#allocation7 + $0x60] sm:$0xff] }
  0x53   :  { %v99_v40 = vld [vmem:[#allocation5 + $0x78] sm:$0xff]  ;;  %v631_v41 = vpack.c.bf16 %v195_v37, %v194_v36  ;;  %v197_v43 = vld [vmem:[#allocation7 + $0x68] sm:$0xff]  ;;  %v198_v47 = vld [vmem:[#allocation7 + $0x70] sm:$0xff] }
  0x54   :  { %618 = vmatpush3.bf16.msra.mxu1 %v615_v17  ;;  %v607_v44 = vpack.c.bf16 %v99_v40, %v98_v39  ;;  %v635_v45 = vpack.c.bf16 %v197_v43, %v196_v42  ;;  %v83_v46 = vld [vmem:[#allocation2 + $0x8] sm:$0xff]  ;;  %v284_v50 = vld [vmem:[#allocation8] sm:$0xff]  ;;  %v285_v51 = vld [vmem:[#allocation8 + $0x8] sm:$0xff] }
  0x55   :  { %590 = vmatpush3.bf16.msra.mxu0 %v587_v8  ;;  %620 = vmatprep.subr.bf16.mxu1 %v619_v23  ;;  %v199_v48 = vld [vmem:[#allocation7 + $0x78] sm:$0xff]  ;;  %v286_v52 = vld [vmem:[#allocation8 + $0x10] sm:$0xff]  ;;  %v643_v53 = vpack.c.bf16 %v285_v51, %v284_v50  ;;  %v288_v56 = vld [vmem:[#allocation8 + $0x20] sm:$0xff] }
  0x56   :  { %592 = vmatprep.subr.bf16.mxu0 %v591_v20  ;;  %v639_v49 = vpack.c.bf16 %v199_v48, %v198_v47  ;;  %v287_v54 = vld [vmem:[#allocation8 + $0x18] sm:$0xff]  ;;  %v289_v57 = vld [vmem:[#allocation8 + $0x28] sm:$0xff]  ;;  %v290_v59 = vld [vmem:[#allocation8 + $0x30] sm:$0xff] }
  0x57   :  { %v647_v55 = vpack.c.bf16 %v287_v54, %v286_v52  ;;  %v651_v58 = vpack.c.bf16 %v289_v57, %v288_v56  ;;  %v291_v60 = vld [vmem:[#allocation8 + $0x38] sm:$0xff]  ;;  %v292_v62 = vld [vmem:[#allocation8 + $0x40] sm:$0xff]  ;;  %v293_v63 = vld [vmem:[#allocation8 + $0x48] sm:$0xff] }
  0x58   :  { %622 = vmatpush3.bf16.msra.mxu1 %v619_v23  ;;  %v655_v61 = vpack.c.bf16 %v291_v60, %v290_v59  ;;  %v659_v0 = vpack.c.bf16 %v293_v63, %v292_v62  ;;  %v294_v1 = vld [vmem:[#allocation8 + $0x50] sm:$0xff]  ;;  %v295_v2 = vld [vmem:[#allocation8 + $0x58] sm:$0xff]  ;;  %v296_v4 = vld [vmem:[#allocation8 + $0x60] sm:$0xff] }
  0x59   :  { %594 = vmatpush3.bf16.msra.mxu0 %v591_v20  ;;  %624 = vmatprep.subr.bf16.mxu1 %v623_v29  ;;  %v663_v3 = vpack.c.bf16 %v295_v2, %v294_v1  ;;  %v297_v5 = vld [vmem:[#allocation8 + $0x68] sm:$0xff]  ;;  %v415_v7 = vld [vmem:[%s955_s2] ss:$0 sm:$0xff]  ;;  %v299_v15 = vld [vmem:[#allocation8 + $0x78] sm:$0xff] }
  0x5a   :  { %596 = vmatprep.subr.bf16.mxu0 %v595_v26  ;;  %v667_v6 = vpack.c.bf16 %v297_v5, %v296_v4  ;;  %v298_v14 = vld [vmem:[#allocation8 + $0x70] sm:$0xff] }
  0x5b   :  { %v671_v16 = vpack.c.bf16 %v299_v15, %v298_v14  ;;  %v416_v17 = vld [vmem:[%s957_s4] ss:$0 sm:$0xff]  ;;  %s814_s4 = smov [#allocation10]  }
  0x5c   :  { %626 = vmatpush3.bf16.msra.mxu1 %v623_v29  ;;  %v417_v24 = vld [vmem:[%s959_s6] ss:$0 sm:$0xff]  ;;  %s401_s8 = sshll.u32 %s814_s4, 4  ;;  %s402_s8 = int_to_ptr.vmem [resolvable:$true] %s401_s8 }
  0x5d   :  { %598 = vmatpush3.bf16.msra.mxu0 %v595_v26  ;;  %628 = vmatprep.subr.bf16.mxu1 %v627_v35  ;;  %s778_s6 = scalar_lea.vmem %s402_s8, 256  ;;  %p783_p5 = scmp.lt.s32.totalorder %s402_s8, %s402_s8 }
  0x5e   :  { %600 = vmatprep.subr.bf16.mxu0 %v599_v32  ;;  %p779_p4 = scmp.ne.s32.totalorder %s402_s8, %s778_s6  ;;  %p784_p6 = scmp.lt.s32.totalorder %s778_s6, %s778_s6 }
  0x60   :  { %630 = vmatpush3.bf16.msra.mxu1 %v627_v35  ;;  %p785_p7 = por %p784_p6, %p783_p5 }
  0x61   :  { %602 = vmatpush3.bf16.msra.mxu0 %v599_v32  ;;  %632 = vmatprep.subr.bf16.mxu1 %v631_v41 }
  0x62   :  { %604 = vmatprep.subr.bf16.mxu0 %v603_v38  ;;  %p786_p8 = pnand %p785_p7, %p779_p4 }
  0x64   :  { %634 = vmatpush3.bf16.msra.mxu1 %v631_v41 }
  0x65   :  { %606 = vmatpush3.bf16.msra.mxu0 %v603_v38  ;;  %636 = vmatprep.subr.bf16.mxu1 %v635_v45 }
  0x66   :  { %608 = vmatprep.subr.bf16.mxu0 %v607_v44 }
  0x68   :  { %638 = vmatpush3.bf16.msra.mxu1 %v635_v45 }
  0x69   :  { %610 = vmatpush3.bf16.msra.mxu0 %v607_v44  ;;  %640 = vmatprep.subr.bf16.mxu1 %v639_v49 }
  0x6a   :  { %644 = vmatprep.subr.bf16.mxu0 %v643_v53 }
  0x6c   :  { %507 = vmatmul.mubr.f32.vlgmr.msra.gmra.mrb[0].mxu0 %v83_v46  ;;  %642 = vmatpush3.bf16.msra.mxu1 %v639_v49 }
  0x6d   :  { %646 = vmatpush3.bf16.msra.mxu0 %v643_v53 }
  0x6e   :  { %648 = vmatprep.subr.bf16.mxu0 %v647_v55 }
  0x71   :  { %650 = vmatpush3.bf16.msra.mxu0 %v647_v55 }
  0x72   :  { %652 = vmatprep.subr.bf16.mxu0 %v651_v58 }
  0x75   :  { %654 = vmatpush3.bf16.msra.mxu0 %v651_v58 }
  0x76   :  { %656 = vmatprep.subr.bf16.mxu0 %v655_v61 }
  0x79   :  { %658 = vmatpush3.bf16.msra.mxu0 %v655_v61 }
  0x7a   :  { %660 = vmatprep.subr.bf16.mxu0 %v659_v0 }
  0x7d   :  { %662 = vmatpush3.bf16.msra.mxu0 %v659_v0 }
  0x7e   :  { %664 = vmatprep.subr.bf16.mxu0 %v663_v3 }
  0x81   :  { %666 = vmatpush3.bf16.msra.mxu0 %v663_v3 }
  0x82   :  { %668 = vmatprep.subr.bf16.mxu0 %v667_v6 }
  0x85   :  { %670 = vmatpush3.bf16.msra.mxu0 %v667_v6 }
  0x86   :  { %672 = vmatprep.subr.bf16.mxu0 %v671_v16 }
  0x89   :  { %674 = vmatpush3.bf16.msra.mxu0 %v671_v16 }
 0x13f   :  { %v508_v8 = vpop.f32.mrb[0].mxu0 }
 0x140   :  { %v179_v9 = vadd.f32 %v508_v8, %v415_v7  ;;  %v173_v10 = vpop.f32.mrb[1].mxu0 }
 0x141   :  { %v174_v11 = vadd.f32 %v415_v7, %v173_v10 }
 0x142   :  { %v183_v13 = vmax.f32 %v179_v9, 0.0 }
 0x143   :  { %v182_v12 = vmax.f32 %v174_v11, 0.0 }
 0x145   :  { %541 = vmatprep.mubr.f32.mxu1 %v182_v12 }
 0x146   :  { %542 = vmatmul.mubr.f32.vlgmr.msra.gmra.mrb[0].mxu1 %v183_v13 }
 0x219   :  { %v543_v18 = vpop.f32.mrb[0].mxu1 }
 0x21a   :  { %v279_v19 = vadd.f32 %v543_v18, %v416_v17  ;;  %v273_v20 = vpop.f32.mrb[1].mxu1 }
 0x21b   :  { %v274_v21 = vadd.f32 %v416_v17, %v273_v20 }
 0x21c   :  { %v283_v23 = vmax.f32 %v279_v19, 0.0 }
 0x21d   :  { %v282_v22 = vmax.f32 %v274_v21, 0.0 }
 0x21f   :  { %576 = vmatprep.mubr.f32.mxu0 %v282_v22 }
 0x220   :  { %577 = vmatmul.mubr.f32.vlgmr.msra.gmra.mrb[2].mxu0 %v283_v23 }
 0x2f3   :  { %v578_v25 = vpop.f32.mrb[2].mxu0 }
 0x2f4   :  { %v379_v26 = vadd.f32 %v578_v25, %v417_v24  ;;  %v373_v27 = vpop.f32.mrb[3].mxu0 }
 0x2f5   :  { %v374_v28 = vadd.f32 %v417_v24, %v373_v27 }
 0x2f6   :  { %v419_v29 = vmul.f32 -1.442695, %v379_v26 }
 0x2f7   :  { %v418_v30 = vmul.f32 -1.442695, %v374_v28 }
 0x2f8   :  { %682 = vpow2.f32 %v419_v29 }
 0x2f9   :  { %684 = vpow2.f32 %v418_v30 }
 0x302   :  { %v683_v31 = vpop.eup %682 }
 0x303   :  { %v685_v32 = vpop.eup %684  ;;  %v389_v33 = vadd.f32 1.0, %v683_v31 }
 0x304   :  { %v388_v34 = vadd.f32 1.0, %v685_v32 }
 0x305   :  { %686 = vrcp.f32 %v389_v33 }
 0x306   :  { %688 = vrcp.f32 %v388_v34 }
 0x30f   :  { %v687_v35 = vpop.eup %686 }
 0x310   :  { %v689_v36 = vpop.eup %688  ;;  %395 = vst [vmem:[#allocation10 + $0x8] sm:$0xff] %v687_v35 }
 0x311   :  { %394 = vst [vmem:[#allocation10] sm:$0xff] %v689_v36 }
 0x312   :  { %789 = shalt.err (!%p786_p8)
}
 0x313   :  { %s790_s11 = scalar_lea.hbm %s960_s7, 256 }
 0x314   :  { %p791_p9 = scmp.ne.s32.totalorder %s960_s7, %s790_s11  ;;  %p794_p10 = scmp.lt.u32.totalorder %s790_s11, %s960_s7 }
 0x316   :  { %p796_p11 = pnand %p794_p10, %p791_p9 }
 0x318   :  { %799 = shalt.err (!%p796_p11)
}
 0x319   :  { %407 = dma.vmem_to_hbm [thread:$0]  %s402_s8, 256, %s960_s7, [#allocation4], %s810_s13, %s810_s13, %s811_s14  }
 0x31a   :  { %806 = dma.done.wait [#allocation4], 256  }
 0x31b   :  { %807 = vsyncadd [#allocation4], 4294967040 }
 0x31c   :  { %411 = vsyncpa [#allocation3], 1 }
 0x31d   :  { %412 = vsyncpa [#allocation6], 1 }
 0x31e   :  { %413 = vsyncpa [#allocation9], 1 }
 0x31f   :  { %414 = vsyncpa [#allocation4], 1 }

</bundles_post_ra>
